<compile_context>
chip_gen: v7x
topology: tpu7x:2x2x1
jax: 0.10.0
libtpu: 0.0.40
codegen_flags: <defaults>
</compile_context>

<pallas_src>
import functools

import jax
import jax.numpy as jnp
from jax.experimental import pallas as pl
from jax.experimental.pallas import tpu as pltpu


def _round_up(n, m):
    return ((n + m - 1) // m) * m


def _sublane_multiple(dtype):
    # Sublane packing granularity: 8 rows for f32, 16 for bf16, 32 for int8/fp8.
    itemsize = jnp.dtype(dtype).itemsize
    return 8 * max(1, 4 // max(1, itemsize))


def _vmem_limit_bytes():
    try:
        cap = int(pltpu.get_tpu_info().vmem_capacity_bytes)
    except Exception:
        cap = 64 * 1024 * 1024  # conservative fallback: v7x per-core VMEM
    # ~3/4 of physical VMEM: ~48 MiB on v7x (64 MiB), ~96 MiB on v5e/v6e (128 MiB).
    return (cap * 3) // 4


def _clamp_block_b(block_b, batch, sub):
    if batch <= sub:
        return batch                       # single full-dim block (always legal)
    max_block = (batch // sub) * sub       # keep block <= B; last tile may be partial
    return max(sub, min(_round_up(block_b, sub), max_block))


def _auto_block_b(batch, feat_dim, num_classes, dtype, vmem_limit):
    itemsize = jnp.dtype(dtype).itemsize
    sub = _sublane_multiple(dtype)
    # Stream ~4 MiB of x per grid step: measured mem-bound tiling sweeps go from
    # ~29% of the HBM roofline at small tiles to ~85% at 512-1024-row tiles.
    target = (4 * 1024 * 1024) // max(1, feat_dim * itemsize)
    # VMEM budget: double-buffered x & labels, double-buffered resident centers,
    # plus rough in-kernel temporaries (x*x in native dtype, xc/dist/select f32).
    budget = (vmem_limit * 4) // 5
    fixed = 2 * num_classes * feat_dim * itemsize + 8 * num_classes * 4 + (1 << 16)
    per_row = 3 * feat_dim * itemsize + 2 * 4 + 3 * 4 * num_classes + 32
    vmem_rows = max(sub, (budget - fixed) // max(1, per_row))
    candidate = max(sub, min(target, vmem_rows))
    return _clamp_block_b(candidate, batch, sub)


def _ccl_kernel(y_ref, x_ref, c_ref, intra_ref, total_ref, *, batch_size, block_b):
    # y_ref: [TB, 1] int32   x_ref: [TB, D]   c_ref: [C, D]
    # intra_ref / total_ref: [1, 8, 128] f32 per-tile partial-sum blocks.
    i = pl.program_id(0)

    x = x_ref[...]                       # native dtype (bf16 stays bf16)
    c = c_ref[...]
    y = y_ref[...]                       # [TB, 1] int32

    tb, d = x.shape
    num_classes = c.shape[0]

    # MXU: x @ c^T contracting over D of both operands (no explicit c.T).
    xc = jax.lax.dot_general(
        x, c, dimension_numbers=(((1,), (1,)), ((), ())),
        preferred_element_type=jnp.float32)                        # [TB, C]

    # MXU: per-row ||x||^2 via (x*x) @ ones_D -- keeps the VALU/XLU off the
    # critical path (near-critical on v7x's 3.2 TB/s HBM), no f32 upcast copy.
    ones_col = jnp.ones((d, 1), dtype=x.dtype)
    x_sq = jax.lax.dot_general(
        x * x, ones_col, dimension_numbers=(((1,), (0,)), ((), ())),
        preferred_element_type=jnp.float32)                        # [TB, 1]

    # MXU: ||c||^2 as a lane-major [1, C] row (ones @ (c*c)^T over D); cheap
    # relative to the main matmul, so recomputed per tile to stay stateless
    # (required for the "parallel" / megacore-shardable grid axis).
    ones_row = jnp.ones((1, d), dtype=c.dtype)
    c_sq = jax.lax.dot_general(
        ones_row, c * c, dimension_numbers=(((1,), (1,)), ((), ())),
        preferred_element_type=jnp.float32)                        # [1, C]

    # Squared-distance expansion (no clamp: the reference has none).
    dist = x_sq + c_sq - 2.0 * xc                                  # [TB, C]

    # Mask padded rows of a partial last tile with a [TB, 1] row mask, applied
    # once to dist.  NOTE: this must stay before the one-hot gather -- padded
    # rows carry garbage labels and are only safe because dist is zeroed here.
    row_ids = jax.lax.broadcasted_iota(jnp.int32, (tb, 1), 0) + i * block_b
    valid = row_ids < batch_size                                   # [TB, 1]
    dist = jnp.where(valid, dist, 0.0)

    # gather(1, y) expressed as a one-hot mask (no redundant AND with `valid`).
    class_ids = jax.lax.broadcasted_iota(jnp.int32, (tb, num_classes), 1)
    same = class_ids == y                                          # [TB, C]

    intra = jnp.sum(jnp.where(same, dist, 0.0), keepdims=True)     # [1, 1]
    total = jnp.sum(dist, keepdims=True)                           # [1, 1]

    # Lane-dense (8, 128) per-tile partials -> unmasked full-vreg stores.
    intra_ref[...] = jnp.broadcast_to(intra, intra_ref.shape).astype(jnp.float32)
    total_ref[...] = jnp.broadcast_to(total, total_ref.shape).astype(jnp.float32)


def contrastive_center_loss(x, y, centers, lambda_c=1.0, block_b=None,
                            compute_dtype=None):
    """Pallas TPU implementation of ContrastiveCenterLoss.forward."""
    B, D = x.shape
    C, Dc = centers.shape
    assert D == Dc, (D, Dc)

    # Optional bf16 streaming: halves the HBM bytes of x (the dominant traffic)
    # on every generation.  Default keeps the caller's dtype to match PyTorch
    # numerics; centers are fed to the MXU in the activation dtype.
    if compute_dtype is not None:
        x = x.astype(compute_dtype)
    centers = centers.astype(x.dtype)
    y2d = y.reshape(B, 1).astype(jnp.int32)

    vmem_limit = _vmem_limit_bytes()
    sub = _sublane_multiple(x.dtype)
    if block_b is None:
        block_b = _auto_block_b(B, D, C, x.dtype, vmem_limit)
    else:
        block_b = _clamp_block_b(block_b, B, sub)
    num_b_tiles = pl.cdiv(B, block_b)

    # TODO(synk): if 2*C*D*itemsize approaches ~1/4 of VMEM (very large class
    # counts, most binding on v7x's 64 MiB), add a second grid axis tiling C
    # with per-C-tile c_sq instead of keeping centers fully resident.
    # TODO(synk): pipeline_mode=pl.Buffered(1) on the constant-index centers
    # spec would save one C*D buffer; left at the default for portability.

    kernel = functools.partial(_ccl_kernel, batch_size=B, block_b=block_b)
    partial_shape = jax.ShapeDtypeStruct((num_b_tiles, 8, 128), jnp.float32)

    intra_p, total_p = pl.pallas_call(
        kernel,
        out_shape=(partial_shape, partial_shape),
        grid=(num_b_tiles,),
        in_specs=[
            pl.BlockSpec((block_b, 1), lambda i: (i, 0)),   # labels (streamed)
            pl.BlockSpec((block_b, D), lambda i: (i, 0)),   # features (streamed)
            pl.BlockSpec((C, D), lambda i: (0, 0)),         # centers (resident)
        ],
        out_specs=(
            pl.BlockSpec((1, 8, 128), lambda i: (i, 0, 0)),  # intra partials
            pl.BlockSpec((1, 8, 128), lambda i: (i, 0, 0)),  # total partials
        ),
        # Batch tiles are independent (per-tile partial outputs, no shared
        # scratch), so the axis is megacore-shardable on v7x.
        compiler_params=pltpu.CompilerParams(
            dimension_semantics=("parallel",),
            vmem_limit_bytes=int(vmem_limit)),
    )(y2d, x, centers)

    # Tiny cross-tile combine + scalar formula in the wrapper.
    intra = jnp.sum(intra_p[:, 0, 0])
    total = jnp.sum(total_p[:, 0, 0])
    inter = total - intra
    epsilon = 1e-6
    return lambda_c / 2.0 / B * intra / (inter + epsilon) / 0.1


def _reference_loss(x, y, centers, lambda_c=1.0):
    # Pure-JAX reference matching the PyTorch formula exactly.
    B = x.shape[0]
    dist = jnp.sum((x[:, None, :] - centers[None, :, :]) ** 2, axis=2)
    intra = jnp.sum(dist[jnp.arange(B), y])
    inter = jnp.sum(dist) - intra
    return lambda_c / 2.0 / B * intra / (inter + 1e-6) / 0.1


if __name__ == "__main__":
    num_classes = 4
    feat_dim = 32
    batch = 20          # not a multiple of the tile -> exercises masking
    lambda_c = 1.0

    key = jax.random.PRNGKey(0)
    kx, ky, kc = jax.random.split(key, 3)

    x = jax.random.normal(kx, (batch, feat_dim), dtype=jnp.float32)
    y = jax.random.randint(ky, (batch,), 0, num_classes, dtype=jnp.int32)
    # nn.Parameter(torch.randn(num_classes, feat_dim)) -> deterministic normal init.
    centers = jax.random.normal(kc, (num_classes, feat_dim), dtype=jnp.float32)

    ref = _reference_loss(x, y, centers, lambda_c=lambda_c)

    # block_b=8 forces a multi-step grid (3 tiles, last one partial) so the
    # parallel-partials / masking paths are exercised even at toy sizes.
    loss = contrastive_center_loss(x, y, centers, lambda_c=lambda_c, block_b=8)
    loss = jax.block_until_ready(loss)
    assert jnp.allclose(loss, ref, rtol=2e-3, atol=1e-6), (loss, ref)

    # Also exercise the auto-sized tiling path (VMEM-aware block_b).
    loss2 = contrastive_center_loss(x, y, centers, lambda_c=lambda_c)
    loss2 = jax.block_until_ready(loss2)
    assert jnp.allclose(loss2, ref, rtol=2e-3, atol=1e-6), (loss2, ref)

    print("KERNEL_OK")
</pallas_src>

<mosaic_0001>
module attributes {stable_mosaic.version = 11 : i64} {
  func.func @_ccl_kernel(%arg0: i32, %arg1: memref<8x1xi32, #tpu.memory_space<vmem>>, %arg2: memref<8x32xf32, #tpu.memory_space<vmem>>, %arg3: memref<4x32xf32, #tpu.memory_space<vmem>>, %arg4: memref<1x8x128xf32, #tpu.memory_space<vmem>>, %arg5: memref<1x8x128xf32, #tpu.memory_space<vmem>>) attributes {dimension_semantics = [#tpu.dimension_semantics<parallel>], iteration_bounds = array<i64: 3>, scalar_prefetch = 0 : i64, scratch_operands = 0 : i64, tpu.core_type = #tpu.core_type<tc>, window_params = [{transform_indices = @transform_0, window_bounds = array<i64: 8, 1>}, {transform_indices = @transform_1, window_bounds = array<i64: 8, 32>}, {pipeline_mode = #tpu.pipeline_mode<synchronous>, transform_indices = @transform_2, window_bounds = array<i64: 4, 32>}, {transform_indices = @transform_3, window_bounds = array<i64: 1, 8, 128>}, {transform_indices = @transform_4, window_bounds = array<i64: 1, 8, 128>}]} {
    %c0 = arith.constant 0 : index
    %c0_0 = arith.constant 0 : index
    %0 = vector.load %arg2[%c0, %c0_0] : memref<8x32xf32, #tpu.memory_space<vmem>>, vector<8x32xf32>
    %c0_1 = arith.constant 0 : index
    %c0_2 = arith.constant 0 : index
    %1 = vector.load %arg3[%c0_1, %c0_2] : memref<4x32xf32, #tpu.memory_space<vmem>>, vector<4x32xf32>
    %c0_3 = arith.constant 0 : index
    %c0_4 = arith.constant 0 : index
    %2 = vector.load %arg1[%c0_3, %c0_4] : memref<8x1xi32, #tpu.memory_space<vmem>>, vector<8x1xi32>
    %cst = arith.constant dense<0.000000e+00> : vector<8x4xf32>
    %3 = tpu.matmul %0, %1, %cst {dimension_numbers = #tpu.dot_dimension_numbers<[1], [1], [0], [0], [0, 0, 1, 0], [], []>} : vector<8x32xf32>, vector<4x32xf32>, vector<8x4xf32> -> vector<8x4xf32>
    %cst_5 = arith.constant 1.000000e+00 : f32
    %4 = vector.broadcast %cst_5 : f32 to vector<32x1xf32>
    %5 = arith.mulf %0, %0 : vector<8x32xf32>
    %cst_6 = arith.constant dense<0.000000e+00> : vector<8x1xf32>
    %6 = tpu.matmul %5, %4, %cst_6 {dimension_numbers = #tpu.dot_dimension_numbers<[1], [0], [0], [1], [0, 0, 1, 1], [], []>} : vector<8x32xf32>, vector<32x1xf32>, vector<8x1xf32> -> vector<8x1xf32>
    %cst_7 = arith.constant 1.000000e+00 : f32
    %7 = vector.broadcast %cst_7 : f32 to vector<1x32xf32>
    %8 = arith.mulf %1, %1 : vector<4x32xf32>
    %cst_8 = arith.constant dense<0.000000e+00> : vector<1x4xf32>
    %9 = tpu.matmul %7, %8, %cst_8 {dimension_numbers = #tpu.dot_dimension_numbers<[1], [1], [0], [0], [0, 0, 1, 0], [], []>} : vector<1x32xf32>, vector<4x32xf32>, vector<1x4xf32> -> vector<1x4xf32>
    %10 = vector.broadcast %6 : vector<8x1xf32> to vector<8x4xf32>
    %11 = vector.broadcast %9 : vector<1x4xf32> to vector<8x4xf32>
    %12 = arith.addf %10, %11 : vector<8x4xf32>
    %cst_9 = arith.constant 2.000000e+00 : f32
    %13 = vector.broadcast %cst_9 : f32 to vector<8x4xf32>
    %14 = arith.mulf %13, %3 : vector<8x4xf32>
    %15 = arith.subf %12, %14 : vector<8x4xf32>
    %16 = tpu.iota {dimensions = array<i32: 0>} : vector<8x1xi32>
    %c8_i32 = arith.constant 8 : i32
    %17 = arith.muli %arg0, %c8_i32 : i32
    %18 = vector.broadcast %17 : i32 to vector<8x1xi32>
    %19 = arith.addi %16, %18 : vector<8x1xi32>
    %c20_i32 = arith.constant 20 : i32
    %20 = vector.broadcast %c20_i32 : i32 to vector<8x1xi32>
    %21 = arith.cmpi slt, %19, %20 : vector<8x1xi32>
    %cst_10 = arith.constant 0.000000e+00 : f32
    %22 = vector.shape_cast %21 : vector<8x1xi1> to vector<8x1xi1>
    %23 = vector.broadcast %22 : vector<8x1xi1> to vector<8x4xi1>
    %24 = vector.broadcast %cst_10 : f32 to vector<8x4xf32>
    %25 = arith.select %23, %15, %24 : vector<8x4xi1>, vector<8x4xf32>
    %26 = tpu.iota {dimensions = array<i32: 1>} : vector<8x4xi32>
    %27 = vector.broadcast %2 : vector<8x1xi32> to vector<8x4xi32>
    %28 = arith.cmpi eq, %26, %27 : vector<8x4xi32>
    %cst_11 = arith.constant 0.000000e+00 : f32
    %29 = vector.broadcast %cst_11 : f32 to vector<8x4xf32>
    %30 = arith.select %28, %25, %29 : vector<8x4xi1>, vector<8x4xf32>
    %31 = vector.shape_cast %30 : vector<8x4xf32> to vector<1x8x4xf32>
    %cst_12 = arith.constant dense<0.000000e+00> : vector<1xf32>
    %32 = vector.multi_reduction <add>, %31, %cst_12 [1, 2] : vector<1x8x4xf32> to vector<1xf32>
    %33 = vector.shape_cast %32 : vector<1xf32> to vector<1x1x1xf32>
    %34 = vector.extract %33[0, 0, 0] : f32 from vector<1x1x1xf32>
    %35 = vector.broadcast %34 : f32 to vector<1x1xf32>
    %36 = vector.shape_cast %25 : vector<8x4xf32> to vector<1x8x4xf32>
    %cst_13 = arith.constant dense<0.000000e+00> : vector<1xf32>
    %37 = vector.multi_reduction <add>, %36, %cst_13 [1, 2] : vector<1x8x4xf32> to vector<1xf32>
    %38 = vector.shape_cast %37 : vector<1xf32> to vector<1x1x1xf32>
    %39 = vector.extract %38[0, 0, 0] : f32 from vector<1x1x1xf32>
    %40 = vector.broadcast %39 : f32 to vector<1x1xf32>
    %41 = vector.shape_cast %35 : vector<1x1xf32> to vector<1x1x1xf32>
    %42 = vector.broadcast %41 : vector<1x1x1xf32> to vector<1x8x128xf32>
    %c0_14 = arith.constant 0 : index
    %c0_15 = arith.constant 0 : index
    %c0_16 = arith.constant 0 : index
    %43 = vector.load %arg4[%c0_14, %c0_15, %c0_16] : memref<1x8x128xf32, #tpu.memory_space<vmem>>, vector<1x8x128xf32>
    tpu.vector_store %arg4[%c0_14, %c0_15, %c0_16], %42 {strides = array<i32>} : memref<1x8x128xf32, #tpu.memory_space<vmem>>, vector<1x8x128xf32>,
    %44 = vector.shape_cast %40 : vector<1x1xf32> to vector<1x1x1xf32>
    %45 = vector.broadcast %44 : vector<1x1x1xf32> to vector<1x8x128xf32>
    %c0_17 = arith.constant 0 : index
    %c0_18 = arith.constant 0 : index
    %c0_19 = arith.constant 0 : index
    %46 = vector.load %arg5[%c0_17, %c0_18, %c0_19] : memref<1x8x128xf32, #tpu.memory_space<vmem>>, vector<1x8x128xf32>
    tpu.vector_store %arg5[%c0_17, %c0_18, %c0_19], %45 {strides = array<i32>} : memref<1x8x128xf32, #tpu.memory_space<vmem>>, vector<1x8x128xf32>,
    return
  }
  func.func @transform_0(%arg0: i32) -> (i32, i32) {
    %c0_i32 = arith.constant 0 : i32
    %c0_i32_0 = arith.constant 0 : i32
    return %arg0, %c0_i32 : i32, i32
  }
  func.func @transform_1(%arg0: i32) -> (i32, i32) {
    %c0_i32 = arith.constant 0 : i32
    %c0_i32_0 = arith.constant 0 : i32
    return %arg0, %c0_i32 : i32, i32
  }
  func.func @transform_2(%arg0: i32) -> (i32, i32) {
    %c0_i32 = arith.constant 0 : i32
    %c0_i32_0 = arith.constant 0 : i32
    %c0_i32_1 = arith.constant 0 : i32
    return %c0_i32, %c0_i32_0 : i32, i32
  }
  func.func @transform_3(%arg0: i32) -> (i32, i32, i32) {
    %c0_i32 = arith.constant 0 : i32
    %c0_i32_0 = arith.constant 0 : i32
    %c0_i32_1 = arith.constant 0 : i32
    return %arg0, %c0_i32, %c0_i32_0 : i32, i32, i32
  }
  func.func @transform_4(%arg0: i32) -> (i32, i32, i32) {
    %c0_i32 = arith.constant 0 : i32
    %c0_i32_0 = arith.constant 0 : i32
    %c0_i32_1 = arith.constant 0 : i32
    return %arg0, %c0_i32, %c0_i32_0 : i32, i32, i32
  }
}

</mosaic_0001>

<bundles_post_ra>
// kernel: tpu_custom_call.1
= control target key start
LH: loop header
LB: loop body
LE: loop exit
PB: predicated region body
PF: predicated region fallthrough
CT: control target
= control target key end

     0   :  { %10 = vsyncpa [#allocation3], 0  ;;  %s1034_s0 = inlined_call_operand.vmem [shape: s32[20,1], index: 0, kind: input, shape index: {}]   ;;  %s1035_s1 = inlined_call_operand.vmem [shape: f32[20,32], index: 1, kind: input, shape index: {}]   ;;  %s1036_s2 = inlined_call_operand.vmem [shape: f32[4,32], index: 2, kind: input, shape index: {}]   ;;  %s1037_s3 = inlined_call_operand.hbm [shape: f32[3,8,128], index: 3, kind: output, shape index: {0}]   ;;  %s1038_s4 = inlined_call_operand.hbm [shape: f32[3,8,128], index: 4, kind: output, shape index: {1}]  }
   0x1   :  { %12 = vsyncpa [#allocation3 + $0x1], 0 }
   0x2   :  { %13 = vsyncpa [#allocation5], 0 }
   0x3   :  { %15 = vsyncpa [#allocation5 + $0x1], 0  ;;  %s878_s15 = smov 0   ;;  %s880_s16 = smov 0  }
   0x4   :  { %s882_s17 = smov 0   ;;  %s884_s18 = smov 0  }
   0x5 LB: > { %s899_s19 = sadd.s32 4294967295, %s843_s18   ;;  %s640_s20 = sadd.s32 4294967294, %s843_s18   ;;  %s843_s18 = sphi %s884_s18, %s1044_s18   ;;  %s839_s17 = sphi %s882_s17, %s1043_s17   ;;  %s835_s16 = sphi %s880_s16, %s1042_s16   ;;  %s831_s15 = sphi %s878_s15, %s1041_s15  }
   0x6   : > { %s903_s21 = sadd.s32 1, %s843_s18   ;;  %s101_s22 = sadd.s32 1, %s839_s17 }
   0x7   : > { %s98_s23 = ssub.s32 %s843_s18, %s903_s21  ;;  %p111_p0 = scmp.ne.s32.totalorder %s839_s17, %s835_s16 }
   0x8   : > { %p99_p1 = scmp.eq.s32.totalorder %s98_s23, 0  ;;  %p112_p2 = scmp.eq.s32.totalorder %s899_s19, 2 }
   0x9   : > { %p117_p3 = scmp.ne.s32.totalorder %s835_s16, %s831_s15  ;;  %p118_p4 = scmp.eq.s32.totalorder %s640_s20, 2 }
   0xa   : > { %s914_s24 = scalar_select %p99_p1, %s839_s17, %s101_s22  }
   0xb   : > { %p916_p5 = por %p112_p2, %p111_p0  ;;  %p920_p6 = por %p118_p4, %p117_p3 }
   0xc   : > { %p643_p7 = scmp.ge.s32.totalorder %s843_s18, 1  ;;  %p179_p8 = scmp.lt.s32.totalorder %s843_s18, 4 }
   0xe   : > { %p180_p9 = pnand %p643_p7, %p179_p8 }
   0xf   : > { %p213_p10 = scmp.lt.s32.totalorder (!%p180_p9), %s899_s19, 2  ;;  %v845_v0 = vmov (!%p180_p9), 0.0|0.0   ;;  %vm846_vm0 = vmmov (!%p180_p9), 0   ;;  %v847_v1 = vmov (!%p180_p9), 0.0   ;;  %v222_v2 = vld [vmem:[%s1036_s2] sm:$0xf] (!%p180_p9)  ;;  %v457_v16 = vlaneseq (!%p180_p9) }
  0x10   : > { %183 = sbr.rel (%p180_p9) target bundleno = 620 (0x26c), region = 32  ;;  %690 = vmatprep.subr.bf16.mxu1 (!%p180_p9), %v845_v0  ;;  %682 = vmatprep.mubr.msk.f32.mxu1 (!%p180_p9), %vm846_vm0, %v847_v1  ;;  %v848_v3 = vmov (!%p180_p9), 1.0|1.0   ;;  %vm224_vm1 = vcmask (!%p180_p9), 261120   ;;  %v375_v4 = vmul.f32 (!%p180_p9), %v222_v2, %v222_v2  ;;  %v849_v5 = vmov (!%p180_p9), 0   ;;  %s653_s11 = sshll.u32 (!%p180_p9), %s899_s19, 3 }
  0x11   : > { %691 = vmatpush3.bf16.msra.mxu1 (!%p180_p9), %v848_v3  ;;  %669 = vmatprep.subr.mxu0 (!%p180_p9), %v847_v1  ;;  %v850_v8 = vmov (!%p180_p9), 1.0   ;;  %v458_v17 = vshrl.u32 (!%p180_p9), %v457_v16, 7  ;;  %v467_v19 = vstv (!%p180_p9), %s653_s11  ;;  %v474_v25 = vand.u32 (!%p180_p9), 127, %v457_v16  ;;  %s947_s12 = sand.u32 (!%p180_p9), 1, %s835_s16   ;;  %s656_s14 = sshll.u32 (!%p180_p9), %s899_s19, 7 }
  0x12   : > { %692 = vmatprep.subr.bf16.mxu1 (!%p180_p9), %v845_v0  ;;  %670 = vmatpush3.xpose.msk.msra.mxu0 (!%p180_p9), %vm224_vm1, %v222_v2  ;;  %vm480_vm3 = vcmask (!%p180_p9), 31744   ;;  %s644_s13 = sshll.u32 (!%p180_p9), %s947_s12, 3  ;;  %s506_s6 = scalar_lea.sflag (!%p180_p9), [#allocation3], %s947_s12 }
  0x13   : > { %671 = vmatprep.mubr.msk.f32.mxu0 (!%p180_p9), %vm846_vm0, %v847_v1  ;;  %685 = vmatprep.subr.mxu0 (!%p180_p9), %v847_v1  ;;  %v459_v18 = vsub.s32 (!%p180_p9), 0, %v458_v17  ;;  %v468_v21 = vadd.s32 (!%p180_p9), %v467_v19, %v458_v17  ;;  %s205_s20 = scalar_lea.vmem (!%p180_p9), [#allocation2], %s644_s13  ;;  %s951_s23 = scalar_lea.vmem (!%p180_p9), [#allocation4], %s644_s13 }
  0x14   : > { %748 = vset.pattern.permute.xlu0 (!%p180_p9), %v849_v5  ;;  %s524_s22 = sshll.u32 (!%p180_p9), %s205_s20, 4  ;;  %s537_s27 = sshll.u32 (!%p180_p9), %s951_s23, 4  ;;  %s961_s22 = int_to_ptr.vmem [resolvable:$true] %s524_s22  ;;  %s963_s27 = int_to_ptr.vmem [resolvable:$true] %s537_s27 }
  0x15   : > { %693 = vmatpush3.bf16.msra.mxu1 (!%p180_p9), %v848_v3  ;;  %vm469_vm2 = vcmp.lt.s32.totalorder (!%p180_p9), %v468_v21, 20  ;;  %s851_s8 = smov (!%p180_p9), [#allocation2]  }
  0x16   : > { %s753_s9 = sshll.u32 (!%p180_p9), %s851_s8, 4  ;;  %s754_s9 = int_to_ptr.vmem [resolvable:$false] %s753_s9 }
  0x17   : > { %s214_s29 = scalar_select %p213_p10, %s899_s19, 2 }
  0x18   : > { %p756_p0 = scmp.lt.s32.totalorder %s961_s22, %s754_s9 }
  0x19   : > { %s646_s30 = sshll.u32 %s214_s29, 3 }
  0x1a   : > { %s220_s7 = scalar_lea.vmem %s1035_s1, %s646_s30  ;;  %s216_s10 = scalar_lea.vmem %s1034_s0, %s646_s30 }
  0x1b   : > { %v221_v6 = vld [vmem:[%s220_s7] sm:$0xff]  ;;  %s959_s30 = scalar_lea.hbm %s1037_s3, %s656_s14  ;;  %s749_s7 = scalar_lea.vmem %s961_s22, 128 }
  0x1c   : > { %v301_v7 = vmul.f32 %v221_v6, %v221_v6  ;;  %672 = vmatmul.mubr.msk.f32.vlgmr.msra.gmra.mrb[0].mxu0 %vm224_vm1, %v221_v6  ;;  %v223_v13 = vld [vmem:[%s216_s10] sm:$0xff]  ;;  %p750_p11 = scmp.ne.s32.totalorder %s961_s22, %s749_s7  ;;  %s755_s10 = scalar_lea.vmem %s754_s9, 256 }
  0x1d   : > { %686 = vmatpush3.xpose.msk.msra.mxu0 %vm224_vm1, %v375_v4  ;;  %687 = vmatprep.mubr.msk.f32.mxu0 %vm846_vm0, %v847_v1  ;;  %p757_p1 = scmp.lt.s32.totalorder %s755_s10, %s749_s7 }
  0x1e   : > { %683 = vmatmul.mubr.msk.f32.vlgmr.msra.gmra.mrb[0].mxu1 %vm224_vm1, %v301_v7  ;;  %p751_p12 = pnand %p750_p11, %p916_p5 }
  0x1f   : > { %p758_p2 = por %p757_p1, %p756_p0 }
  0x20   : > { %688 = vmatmul.mubr.msk.f32.vlgmr.msra.gmra.mrb[2].mxu0 %vm224_vm1, %v850_v8  ;;  %p752_p13 = pneg %p751_p12 }
  0x22   : > { %p759_p3 = pnand %p758_p2, %p752_p13 }
  0xef   : > { %v297_v9 = vpop.f32.mrb[0].mxu0 }
  0xf0   : > { %v673_v10 = vpop.f32.mrb[1].mxu0  ;;  %v462_v23 = vmul.f32 2.0, %v297_v9 }
  0xf1   : > { %v371_v11 = vpop.f32.mrb[0].mxu1 }
  0xf2   : > { %454 = vperm.xlu0 %748, %v371_v11   ;;  %v684_v12 = vpop.f32.mrb[1].mxu1 }
  0xf3   : > { %v448_v14 = vpop.f32.mrb[2].mxu0 }
  0xf4   : > { %v689_v15 = vpop.f32.mrb[3].mxu0  ;;  %v460_v20 = vrot.slane %v448_v14, %v459_v18 }
  0xf6   : > { %476 = vperm.xlu0 %748, %v223_v13  }
 0x171   : > { %v455_v22 = vpop.permute.xlu0 %454 }
 0x172   : > { %v461_v24 = vadd.f32 %v460_v20, %v455_v22 }
 0x174   : > { %v463_v26 = vsub.f32 %v461_v24, %v462_v23 }
 0x175   : > { %v477_v27 = vpop.permute.xlu0 %476 }
 0x176   : > { %vm478_vm4 = vcmp.eq.s32.totalorder %v474_v25, %v477_v27  ;;  %v472_v28 = vsel %vm469_vm2, %v463_v26, 0.0 }
 0x177   : > { %v479_v29 = vsel %vm478_vm4, %v472_v28, 0.0  ;;  %v491_v31 = vsel %vm480_vm3, %v472_v28, 0.0 }
 0x178   : > { %v481_v30 = vsel %vm480_vm3, %v479_v29, 0.0 }
 0x179   : > { %482 = vadd.xlane.f32.xlu1 %v481_v30 }
 0x17d   : > { %492 = vadd.xlane.f32.xlu1 %v491_v31 }
 0x206   : > { %v483_v32 = vpop.xlane.xlu1 %482 }
 0x207   : > { %v484_v33 = vrot.slane %v483_v32, 4 }
 0x209   : > { %v485_v34 = vadd.f32 %v484_v33, %v483_v32 }
 0x20a   : > { %v493_v35 = vpop.xlane.xlu1 %492 }
 0x20b   : > { %v486_v36 = vrot.slane %v485_v34, 2  ;;  %v494_v37 = vrot.slane %v493_v35, 4 }
 0x20d   : > { %v495_v38 = vadd.f32 %v494_v37, %v493_v35  ;;  %v487_v39 = vadd.f32 %v486_v36, %v485_v34 }
 0x20f   : > { %v496_v40 = vrot.slane %v495_v38, 2  ;;  %v488_v41 = vrot.slane %v487_v39, 1 }
 0x211   : > { %v497_v42 = vadd.f32 %v496_v40, %v495_v38  ;;  %v489_v43 = vadd.f32 %v488_v41, %v487_v39 }
 0x213   : > { %694 = vpush %v489_v43  ;;  %v498_v44 = vrot.slane %v497_v42, 1 }
 0x215   : > { %v499_v45 = vadd.f32 %v498_v44, %v497_v42 }
 0x217   : > { %696 = vpush %v499_v45 }
 0x244   : > { %s695_s5 = spop %694 }
 0x245   : > { %v501_v46 = vstv %s695_s5 }
 0x246   : > { %502 = vst [vmem:[%s205_s20] sm:$0xff] %v501_v46 }
 0x247   : > { %762 = shalt.err (!%p759_p3)
}
 0x248   : > { %s763_s11 = scalar_lea.hbm %s959_s30, 128  ;;  %s767_s28 = scalar_lea.hbm %s1037_s3, 384 }
 0x249   : > { %p764_p4 = scmp.ne.s32.totalorder %s959_s30, %s763_s11  ;;  %p768_p9 = scmp.lt.u32.totalorder %s959_s30, %s1037_s3 }
 0x24a   : > { %p769_p10 = scmp.lt.u32.totalorder %s767_s28, %s763_s11  ;;  %p771_p12 = scmp.lt.u32.totalorder %s763_s11, %s959_s30 }
 0x24b   : > { %p765_p7 = pnand %p764_p4, %p916_p5 }
 0x24c   : > { %p770_p11 = por %p769_p10, %p768_p9 }
 0x24d   : > { %p766_p8 = pneg %p765_p7 }
 0x24e   : > { %p772_p13 = por %p771_p12, %p770_p11 }
 0x250   : > { %p773_p0 = pnand %p772_p13, %p766_p8 }
 0x252   : > { %776 = shalt.err (!%p773_p0)
}
 0x253   : > { %698 = dma.vmem_to_hbm [thread:$0]  (%p916_p5), %s961_s22, 128, %s959_s30, %s506_s6  }
 0x254   : > { %s697_s7 = spop %696  ;;  %s992_s10 = scalar_lea.hbm %s1038_s4, %s656_s14 }
 0x255   : > { %v503_v47 = vstv %s697_s7  ;;  %s511_s11 = scalar_lea.sflag [#allocation5], %s947_s12  ;;  %s777_s13 = scalar_lea.vmem %s963_s27, 128 }
 0x256   : > { %504 = vst [vmem:[%s951_s23] sm:$0xff] %v503_v47  ;;  %p778_p1 = scmp.ne.s32.totalorder %s963_s27, %s777_s13  ;;  %s852_s20 = smov [#allocation4]  }
 0x257   : > { %s781_s28 = sshll.u32 %s852_s20, 4  ;;  %s782_s28 = int_to_ptr.vmem [resolvable:$false] %s781_s28 }
 0x258   : > { %p779_p2 = pnand %p778_p1, %p916_p5  ;;  %s783_s29 = scalar_lea.vmem %s782_s28, 256 }
 0x259   : > { %p784_p4 = scmp.lt.s32.totalorder %s963_s27, %s782_s28  ;;  %p785_p7 = scmp.lt.s32.totalorder %s783_s29, %s777_s13 }
 0x25a   : > { %p780_p3 = pneg %p779_p2 }
 0x25b   : > { %p786_p8 = por %p785_p7, %p784_p4 }
 0x25d   : > { %p787_p9 = pnand %p786_p8, %p780_p3 }
 0x25f   : > { %790 = shalt.err (!%p787_p9)
}
 0x260   : > { %s791_s19 = scalar_lea.hbm %s992_s10, 128  ;;  %s795_s22 = scalar_lea.hbm %s1038_s4, 384 }
 0x261   : > { %p792_p10 = scmp.ne.s32.totalorder %s992_s10, %s791_s19  ;;  %p796_p13 = scmp.lt.u32.totalorder %s992_s10, %s1038_s4 }
 0x262   : > { %p797_p0 = scmp.lt.u32.totalorder %s795_s22, %s791_s19  ;;  %p799_p2 = scmp.lt.u32.totalorder %s791_s19, %s992_s10 }
 0x263   : > { %p793_p11 = pnand %p792_p10, %p916_p5 }
 0x264   : > { %p798_p1 = por %p797_p0, %p796_p13 }
 0x265   : > { %p794_p12 = pneg %p793_p11 }
 0x266   : > { %p800_p3 = por %p799_p2, %p798_p1 }
 0x268   : > { %p801_p4 = pnand %p800_p3, %p794_p12 }
 0x26a   : > { %804 = shalt.err (!%p801_p4)
}
 0x26b   : > { %699 = dma.vmem_to_hbm [thread:$0]  (%p916_p5), %s963_s27, 128, %s992_s10, %s511_s11  }
 0x26c PF: > { %p709_p7 = scmp.ge.s32.totalorder %s843_s18, 2  ;;  %s549_s6 = sand.u32 1, %s831_s15  }
 0x26d   : > { %s550_s5 = scalar_lea.sflag [#allocation3], %s549_s6 }
 0x26e   : > { %p703_p8 = pnand %p709_p7, %p920_p6 }
 0x270   : > { %822 = dma.done.wait (!%p703_p8), %s550_s5, 128  }
 0x271   : > { %824 = vsyncadd (!%p703_p8), %s550_s5, 4294967168  ;;  %s559_s7 = scalar_lea.sflag [#allocation5], %s549_s6 }
 0x272   : > { %826 = dma.done.wait (!%p703_p8), %s559_s7, 128  }
 0x273   : > { %828 = vsyncadd (!%p703_p8), %s559_s7, 4294967168  ;;  %p18_p5 = scmp.ge.s32.totalorder %s903_s21, 5   ;;  %s1041_s15 = smov %s835_s16 }
 0x274   : > { %s1042_s16 = smov %s839_s17  ;;  %s1043_s17 = smov %s914_s24 }
 0x275   : > { %s1044_s18 = smov %s903_s21  ;;  %20 = sbr.rel (!%p18_p5) target bundleno = 5 (0x5), region = 87 }
 0x27c   :  { %564 = vsyncpa [#allocation3], 1 }
 0x27d   :  { %566 = vsyncpa [#allocation3 + $0x1], 1 }
 0x27e   :  { %567 = vsyncpa [#allocation5], 1 }
 0x27f   :  { %569 = vsyncpa [#allocation5 + $0x1], 1 }

</bundles_post_ra>
